<compile_context>
chip_gen: v5e
topology: v5e:2x2
jax: 0.10.0
libtpu: 0.0.40
codegen_flags: <defaults>
</compile_context>

<pallas_src>
import functools

import jax
import jax.numpy as jnp
from jax.experimental import pallas as pl
from jax.experimental.pallas import tpu as pltpu

_LANE = 128
_MAX_BLOCK_ROWS = 2048  # (2048,128) f32 = 1 MiB; 6 streams x 2 buffers = 12 MiB VMEM


def _stats_kernel(lp_ref, lt_ref, lw_ref, mp_ref, mt_ref, mw_ref, out_ref, *,
                  lsd_blocks, lsd_rows, mask_rows, block_l, block_m):
    """Writes per-block per-lane partial stats [sum(scale|w>0), count(w>0), count(scale!=0)]."""
    i = pl.program_id(0)

    def emit(p, t, w, base_row, n_rows, blk, bce):
        # Mask rows beyond the real array (cdiv tail block -> stale/garbage VMEM).
        rid = jax.lax.broadcasted_iota(jnp.int32, (blk, 1), 0) + base_row
        valid = rid < n_rows
        p = jnp.where(valid, p.astype(jnp.float32), 0.5 if bce else 0.0)
        t = jnp.where(valid, t.astype(jnp.float32), 0.0)
        w = jnp.where(valid, w.astype(jnp.float32), 0.0)
        if bce:
            # Faithful to the module: raw log, no clamping (module uses torch.log).
            scale = -w * (t * jnp.log(p) + (1.0 - t) * jnp.log(1.0 - p))
        else:
            d = p - t
            scale = w * d * d
        pos = w > 0.0
        # Sublane-only reductions (pure VPU adds); cross-lane reduce is done by
        # XLA on the tiny (num_blocks, 3, 128) partials array in the wrapper.
        out_ref[0, 0, :] = jnp.sum(jnp.where(pos, scale, 0.0), axis=0)
        out_ref[0, 1, :] = jnp.sum(pos.astype(jnp.float32), axis=0)
        out_ref[0, 2, :] = jnp.sum((scale != 0.0).astype(jnp.float32), axis=0)

    @pl.when(i < lsd_blocks)
    def _():
        emit(lp_ref[...], lt_ref[...], lw_ref[...],
             i * block_l, lsd_rows, block_l, bce=False)

    @pl.when(i >= lsd_blocks)
    def _():
        emit(mp_ref[...], mt_ref[...], mw_ref[...],
             (i - lsd_blocks) * block_m, mask_rows, block_m, bce=True)


def _as_lane_rows(x, fill):
    """Flatten to (rows, 128). Pads with `fill` only when numel % 128 != 0."""
    x = x.reshape(-1)
    pad = (-x.shape[0]) % _LANE
    if pad:
        x = jnp.pad(x, (0, pad), constant_values=fill)
    return x.reshape(-1, _LANE)


@jax.jit
def weighted_loss(pred_lsd, target_lsd, lsd_weights,
                  pred_mask, target_mask, mask_weights):
    # Lane-dense 2-D views (no copy when numel is a multiple of 128).
    # Pad fills are chosen so padded elements contribute exactly 0 to every stat.
    lp = _as_lane_rows(pred_lsd, 0.0)
    lt = _as_lane_rows(target_lsd, 0.0)
    lw = _as_lane_rows(lsd_weights, 0.0)
    mp = _as_lane_rows(pred_mask, 0.5)   # away from log() singularities
    mt = _as_lane_rows(target_mask, 0.0)
    mw = _as_lane_rows(mask_weights, 0.0)

    lsd_rows, mask_rows = lp.shape[0], mp.shape[0]
    block_l = min(_MAX_BLOCK_ROWS, lsd_rows)
    block_m = min(_MAX_BLOCK_ROWS, mask_rows)
    lsd_blocks = pl.cdiv(lsd_rows, block_l)
    mask_blocks = pl.cdiv(mask_rows, block_m)
    total_blocks = lsd_blocks + mask_blocks

    kernel = functools.partial(
        _stats_kernel, lsd_blocks=lsd_blocks, lsd_rows=lsd_rows,
        mask_rows=mask_rows, block_l=block_l, block_m=block_m)

    def lsd_map(i):
        # Clamp during the mask phase -> block index unchanged -> no extra DMA.
        return (jnp.minimum(i, lsd_blocks - 1), 0)

    def mask_map(i):
        # Stays at block 0 during the LSD phase -> fetched once, reused at phase start.
        return (jnp.maximum(i - lsd_blocks, 0), 0)

    partials = pl.pallas_call(
        kernel,
        out_shape=jax.ShapeDtypeStruct((total_blocks, 3, _LANE), jnp.float32),
        grid=(total_blocks,),
        in_specs=[
            pl.BlockSpec((block_l, _LANE), lsd_map),
            pl.BlockSpec((block_l, _LANE), lsd_map),
            pl.BlockSpec((block_l, _LANE), lsd_map),
            pl.BlockSpec((block_m, _LANE), mask_map),
            pl.BlockSpec((block_m, _LANE), mask_map),
            pl.BlockSpec((block_m, _LANE), mask_map),
        ],
        out_specs=pl.BlockSpec((1, 3, _LANE), lambda i: (i, 0, 0)),
        compiler_params=pltpu.CompilerParams(
            # Each step owns its own output tile -> reduction finishes in the
            # wrapper, so the grid can be sharded across TensorCores (v7x).
            dimension_semantics=("parallel",),
            # 12 MiB of double-buffered inputs; fits every generation with headroom.
            vmem_limit_bytes=32 * 1024 * 1024,
        ),
    )(lp, lt, lw, mp, mt, mw)

    lsd_stats = jnp.sum(partials[:lsd_blocks], axis=(0, 2))    # (3,)
    mask_stats = jnp.sum(partials[lsd_blocks:], axis=(0, 2))   # (3,)

    def finalize(s):
        # torch: if any(scale != 0) -> mean(scale[w > 0]); else mean(scale) == 0
        # (scale is identically zero in that branch). 0/0 in the unselected
        # branch is discarded by jnp.where (forward-only kernel).
        return jnp.where(s[2] > 0.0, s[0] / s[1], jnp.float32(0.0))

    return finalize(lsd_stats) + finalize(mask_stats)


def _reference(pred_lsd, target_lsd, lsd_weights, pred_mask, target_mask, mask_weights):
    """Pure-JAX replica of the PyTorch forward (for a sanity check)."""
    def masked_mean(scale, weights):
        any_nonzero = jnp.sum((scale != 0.0).astype(jnp.float32)) > 0.0
        pos = weights > 0.0
        m_mean = jnp.sum(jnp.where(pos, scale, 0.0)) / jnp.sum(pos.astype(jnp.float32))
        return jnp.where(any_nonzero, m_mean, jnp.mean(scale))

    s1 = lsd_weights * (pred_lsd - target_lsd) ** 2
    s2 = (-mask_weights * target_mask * jnp.log(pred_mask)
          - (1.0 - target_mask) * mask_weights * jnp.log(1.0 - pred_mask))
    return masked_mean(s1, lsd_weights) + masked_mean(s2, mask_weights)


if __name__ == "__main__":
    key = jax.random.PRNGKey(0)
    k = jax.random.split(key, 6)

    # NCHW-style inputs: LSD head (4 channels), mask head (1 channel).
    lsd_shape = (2, 4, 16, 16)
    mask_shape = (2, 1, 16, 16)

    pred_lsd = jax.random.uniform(k[0], lsd_shape, jnp.float32)
    target_lsd = jax.random.uniform(k[1], lsd_shape, jnp.float32)
    # Weights: non-negative with some exact zeros (masked-out voxels).
    lsd_weights = jnp.where(
        jax.random.uniform(k[2], lsd_shape) > 0.3,
        jax.random.uniform(k[2], lsd_shape, jnp.float32), 0.0)

    # BCE pred must lie strictly in (0, 1).
    pred_mask = jax.nn.sigmoid(jax.random.normal(k[3], mask_shape, jnp.float32))
    target_mask = (jax.random.uniform(k[4], mask_shape) > 0.5).astype(jnp.float32)
    mask_weights = jnp.where(
        jax.random.uniform(k[5], mask_shape) > 0.3,
        jax.random.uniform(k[5], mask_shape, jnp.float32), 0.0)

    out = weighted_loss(pred_lsd, target_lsd, lsd_weights,
                        pred_mask, target_mask, mask_weights)
    out = jax.block_until_ready(out)

    ref = _reference(pred_lsd, target_lsd, lsd_weights,
                     pred_mask, target_mask, mask_weights)
    assert jnp.allclose(out, ref, rtol=1e-5, atol=1e-5), (out, ref)

    print("KERNEL_OK")
</pallas_src>

<mosaic_0001>
module attributes {stable_mosaic.version = 11 : i64} {
  func.func @_stats_kernel(%arg0: i32, %arg1: memref<16x128xf32, #tpu.memory_space<vmem>>, %arg2: memref<16x128xf32, #tpu.memory_space<vmem>>, %arg3: memref<16x128xf32, #tpu.memory_space<vmem>>, %arg4: memref<4x128xf32, #tpu.memory_space<vmem>>, %arg5: memref<4x128xf32, #tpu.memory_space<vmem>>, %arg6: memref<4x128xf32, #tpu.memory_space<vmem>>, %arg7: memref<1x3x128xf32, #tpu.memory_space<vmem>>) attributes {dimension_semantics = [#tpu.dimension_semantics<parallel>], iteration_bounds = array<i64: 2>, scalar_prefetch = 0 : i64, scratch_operands = 0 : i64, tpu.core_type = #tpu.core_type<tc>, window_params = [{transform_indices = @transform_0, window_bounds = array<i64: 16, 128>}, {transform_indices = @transform_1, window_bounds = array<i64: 16, 128>}, {transform_indices = @transform_2, window_bounds = array<i64: 16, 128>}, {transform_indices = @transform_3, window_bounds = array<i64: 4, 128>}, {transform_indices = @transform_4, window_bounds = array<i64: 4, 128>}, {transform_indices = @transform_5, window_bounds = array<i64: 4, 128>}, {transform_indices = @transform_6, window_bounds = array<i64: 1, 3, 128>}]} {
    %c1_i32 = arith.constant 1 : i32
    %0 = arith.cmpi slt, %arg0, %c1_i32 : i32
    %1 = arith.extui %0 : i1 to i32
    %c0_i32 = arith.constant 0 : i32
    %2 = arith.cmpi ne, %1, %c0_i32 : i32
    scf.if %2 {
      %c0 = arith.constant 0 : index
      %c0_2 = arith.constant 0 : index
      %6 = vector.load %arg1[%c0, %c0_2] : memref<16x128xf32, #tpu.memory_space<vmem>>, vector<16x128xf32>
      %c0_3 = arith.constant 0 : index
      %c0_4 = arith.constant 0 : index
      %7 = vector.load %arg2[%c0_3, %c0_4] : memref<16x128xf32, #tpu.memory_space<vmem>>, vector<16x128xf32>
      %c0_5 = arith.constant 0 : index
      %c0_6 = arith.constant 0 : index
      %8 = vector.load %arg3[%c0_5, %c0_6] : memref<16x128xf32, #tpu.memory_space<vmem>>, vector<16x128xf32>
      %c16_i32 = arith.constant 16 : i32
      %9 = arith.muli %arg0, %c16_i32 : i32
      %10 = tpu.iota {dimensions = array<i32: 0>} : vector<16x1xi32>
      %11 = vector.broadcast %9 : i32 to vector<16x1xi32>
      %12 = arith.addi %10, %11 : vector<16x1xi32>
      %c16_i32_7 = arith.constant 16 : i32
      %13 = vector.broadcast %c16_i32_7 : i32 to vector<16x1xi32>
      %14 = arith.cmpi slt, %12, %13 : vector<16x1xi32>
      %cst = arith.constant 0.000000e+00 : f32
      %15 = vector.shape_cast %14 : vector<16x1xi1> to vector<16x1xi1>
      %16 = vector.broadcast %15 : vector<16x1xi1> to vector<16x128xi1>
      %17 = vector.broadcast %cst : f32 to vector<16x128xf32>
      %18 = arith.select %16, %6, %17 : vector<16x128xi1>, vector<16x128xf32>
      %cst_8 = arith.constant 0.000000e+00 : f32
      %19 = vector.shape_cast %14 : vector<16x1xi1> to vector<16x1xi1>
      %20 = vector.broadcast %19 : vector<16x1xi1> to vector<16x128xi1>
      %21 = vector.broadcast %cst_8 : f32 to vector<16x128xf32>
      %22 = arith.select %20, %7, %21 : vector<16x128xi1>, vector<16x128xf32>
      %cst_9 = arith.constant 0.000000e+00 : f32
      %23 = vector.shape_cast %14 : vector<16x1xi1> to vector<16x1xi1>
      %24 = vector.broadcast %23 : vector<16x1xi1> to vector<16x128xi1>
      %25 = vector.broadcast %cst_9 : f32 to vector<16x128xf32>
      %26 = arith.select %24, %8, %25 : vector<16x128xi1>, vector<16x128xf32>
      %27 = arith.subf %18, %22 : vector<16x128xf32>
      %28 = arith.mulf %26, %27 : vector<16x128xf32>
      %29 = arith.mulf %28, %27 : vector<16x128xf32>
      %cst_10 = arith.constant 0.000000e+00 : f32
      %30 = vector.broadcast %cst_10 : f32 to vector<16x128xf32>
      %31 = arith.cmpf ogt, %26, %30 : vector<16x128xf32>
      %cst_11 = arith.constant 0.000000e+00 : f32
      %32 = vector.broadcast %cst_11 : f32 to vector<16x128xf32>
      %33 = arith.select %31, %29, %32 : vector<16x128xi1>, vector<16x128xf32>
      %cst_12 = arith.constant dense<0.000000e+00> : vector<128xf32>
      %34 = vector.multi_reduction <add>, %33, %cst_12 [0] : vector<16x128xf32> to vector<128xf32>
      %c0_13 = arith.constant 0 : index
      %c0_14 = arith.constant 0 : index
      %c0_15 = arith.constant 0 : index
      %35 = vector.load %arg7[%c0_13, %c0_14, %c0_15] : memref<1x3x128xf32, #tpu.memory_space<vmem>>, vector<1x1x128xf32>
      %36 = vector.shape_cast %35 : vector<1x1x128xf32> to vector<128xf32>
      %37 = vector.shape_cast %34 : vector<128xf32> to vector<1x1x128xf32>
      tpu.vector_store %arg7[%c0_13, %c0_14, %c0_15], %37 {strides = array<i32>} : memref<1x3x128xf32, #tpu.memory_space<vmem>>, vector<1x1x128xf32>,
      %38 = arith.extui %31 : vector<16x128xi1> to vector<16x128xi32>
      %39 = arith.sitofp %38 : vector<16x128xi32> to vector<16x128xf32>
      %cst_16 = arith.constant dense<0.000000e+00> : vector<128xf32>
      %40 = vector.multi_reduction <add>, %39, %cst_16 [0] : vector<16x128xf32> to vector<128xf32>
      %c0_17 = arith.constant 0 : index
      %c1 = arith.constant 1 : index
      %c0_18 = arith.constant 0 : index
      %41 = vector.load %arg7[%c0_17, %c1, %c0_18] : memref<1x3x128xf32, #tpu.memory_space<vmem>>, vector<1x1x128xf32>
      %42 = vector.shape_cast %41 : vector<1x1x128xf32> to vector<128xf32>
      %43 = vector.shape_cast %40 : vector<128xf32> to vector<1x1x128xf32>
      tpu.vector_store %arg7[%c0_17, %c1, %c0_18], %43 {strides = array<i32>} : memref<1x3x128xf32, #tpu.memory_space<vmem>>, vector<1x1x128xf32>,
      %cst_19 = arith.constant 0.000000e+00 : f32
      %44 = vector.broadcast %cst_19 : f32 to vector<16x128xf32>
      %45 = arith.cmpf one, %29, %44 : vector<16x128xf32>
      %46 = arith.extui %45 : vector<16x128xi1> to vector<16x128xi32>
      %47 = arith.sitofp %46 : vector<16x128xi32> to vector<16x128xf32>
      %cst_20 = arith.constant dense<0.000000e+00> : vector<128xf32>
      %48 = vector.multi_reduction <add>, %47, %cst_20 [0] : vector<16x128xf32> to vector<128xf32>
      %c0_21 = arith.constant 0 : index
      %c2 = arith.constant 2 : index
      %c0_22 = arith.constant 0 : index
      %49 = vector.load %arg7[%c0_21, %c2, %c0_22] : memref<1x3x128xf32, #tpu.memory_space<vmem>>, vector<1x1x128xf32>
      %50 = vector.shape_cast %49 : vector<1x1x128xf32> to vector<128xf32>
      %51 = vector.shape_cast %48 : vector<128xf32> to vector<1x1x128xf32>
      tpu.vector_store %arg7[%c0_21, %c2, %c0_22], %51 {strides = array<i32>} : memref<1x3x128xf32, #tpu.memory_space<vmem>>, vector<1x1x128xf32>,
    } else {
    }
    %c1_i32_0 = arith.constant 1 : i32
    %3 = arith.cmpi sge, %arg0, %c1_i32_0 : i32
    %4 = arith.extui %3 : i1 to i32
    %c0_i32_1 = arith.constant 0 : i32
    %5 = arith.cmpi ne, %4, %c0_i32_1 : i32
    scf.if %5 {
      %c0 = arith.constant 0 : index
      %c0_2 = arith.constant 0 : index
      %6 = vector.load %arg4[%c0, %c0_2] : memref<4x128xf32, #tpu.memory_space<vmem>>, vector<4x128xf32>
      %c0_3 = arith.constant 0 : index
      %c0_4 = arith.constant 0 : index
      %7 = vector.load %arg5[%c0_3, %c0_4] : memref<4x128xf32, #tpu.memory_space<vmem>>, vector<4x128xf32>
      %c0_5 = arith.constant 0 : index
      %c0_6 = arith.constant 0 : index
      %8 = vector.load %arg6[%c0_5, %c0_6] : memref<4x128xf32, #tpu.memory_space<vmem>>, vector<4x128xf32>
      %c1_i32_7 = arith.constant 1 : i32
      %9 = arith.subi %arg0, %c1_i32_7 : i32
      %c4_i32 = arith.constant 4 : i32
      %10 = arith.muli %9, %c4_i32 : i32
      %11 = tpu.iota {dimensions = array<i32: 0>} : vector<4x1xi32>
      %12 = vector.broadcast %10 : i32 to vector<4x1xi32>
      %13 = arith.addi %11, %12 : vector<4x1xi32>
      %c4_i32_8 = arith.constant 4 : i32
      %14 = vector.broadcast %c4_i32_8 : i32 to vector<4x1xi32>
      %15 = arith.cmpi slt, %13, %14 : vector<4x1xi32>
      %cst = arith.constant 5.000000e-01 : f32
      %16 = vector.shape_cast %15 : vector<4x1xi1> to vector<4x1xi1>
      %17 = vector.broadcast %16 : vector<4x1xi1> to vector<4x128xi1>
      %18 = vector.broadcast %cst : f32 to vector<4x128xf32>
      %19 = arith.select %17, %6, %18 : vector<4x128xi1>, vector<4x128xf32>
      %cst_9 = arith.constant 0.000000e+00 : f32
      %20 = vector.shape_cast %15 : vector<4x1xi1> to vector<4x1xi1>
      %21 = vector.broadcast %20 : vector<4x1xi1> to vector<4x128xi1>
      %22 = vector.broadcast %cst_9 : f32 to vector<4x128xf32>
      %23 = arith.select %21, %7, %22 : vector<4x128xi1>, vector<4x128xf32>
      %cst_10 = arith.constant 0.000000e+00 : f32
      %24 = vector.shape_cast %15 : vector<4x1xi1> to vector<4x1xi1>
      %25 = vector.broadcast %24 : vector<4x1xi1> to vector<4x128xi1>
      %26 = vector.broadcast %cst_10 : f32 to vector<4x128xf32>
      %27 = arith.select %25, %8, %26 : vector<4x128xi1>, vector<4x128xf32>
      %cst_11 = arith.constant 0.000000e+00 : f32
      %28 = vector.broadcast %cst_11 : f32 to vector<4x128xf32>
      %29 = arith.subf %28, %27 : vector<4x128xf32>
      %30 = math.log %19 : vector<4x128xf32>
      %31 = arith.mulf %23, %30 : vector<4x128xf32>
      %cst_12 = arith.constant 1.000000e+00 : f32
      %32 = vector.broadcast %cst_12 : f32 to vector<4x128xf32>
      %33 = arith.subf %32, %23 : vector<4x128xf32>
      %cst_13 = arith.constant 1.000000e+00 : f32
      %34 = vector.broadcast %cst_13 : f32 to vector<4x128xf32>
      %35 = arith.subf %34, %19 : vector<4x128xf32>
      %36 = math.log %35 : vector<4x128xf32>
      %37 = arith.mulf %33, %36 : vector<4x128xf32>
      %38 = arith.addf %31, %37 : vector<4x128xf32>
      %39 = arith.mulf %29, %38 : vector<4x128xf32>
      %cst_14 = arith.constant 0.000000e+00 : f32
      %40 = vector.broadcast %cst_14 : f32 to vector<4x128xf32>
      %41 = arith.cmpf ogt, %27, %40 : vector<4x128xf32>
      %cst_15 = arith.constant 0.000000e+00 : f32
      %42 = vector.broadcast %cst_15 : f32 to vector<4x128xf32>
      %43 = arith.select %41, %39, %42 : vector<4x128xi1>, vector<4x128xf32>
      %cst_16 = arith.constant dense<0.000000e+00> : vector<128xf32>
      %44 = vector.multi_reduction <add>, %43, %cst_16 [0] : vector<4x128xf32> to vector<128xf32>
      %c0_17 = arith.constant 0 : index
      %c0_18 = arith.constant 0 : index
      %c0_19 = arith.constant 0 : index
      %45 = vector.load %arg7[%c0_17, %c0_18, %c0_19] : memref<1x3x128xf32, #tpu.memory_space<vmem>>, vector<1x1x128xf32>
      %46 = vector.shape_cast %45 : vector<1x1x128xf32> to vector<128xf32>
      %47 = vector.shape_cast %44 : vector<128xf32> to vector<1x1x128xf32>
      tpu.vector_store %arg7[%c0_17, %c0_18, %c0_19], %47 {strides = array<i32>} : memref<1x3x128xf32, #tpu.memory_space<vmem>>, vector<1x1x128xf32>,
      %48 = arith.extui %41 : vector<4x128xi1> to vector<4x128xi32>
      %49 = arith.sitofp %48 : vector<4x128xi32> to vector<4x128xf32>
      %cst_20 = arith.constant dense<0.000000e+00> : vector<128xf32>
      %50 = vector.multi_reduction <add>, %49, %cst_20 [0] : vector<4x128xf32> to vector<128xf32>
      %c0_21 = arith.constant 0 : index
      %c1 = arith.constant 1 : index
      %c0_22 = arith.constant 0 : index
      %51 = vector.load %arg7[%c0_21, %c1, %c0_22] : memref<1x3x128xf32, #tpu.memory_space<vmem>>, vector<1x1x128xf32>
      %52 = vector.shape_cast %51 : vector<1x1x128xf32> to vector<128xf32>
      %53 = vector.shape_cast %50 : vector<128xf32> to vector<1x1x128xf32>
      tpu.vector_store %arg7[%c0_21, %c1, %c0_22], %53 {strides = array<i32>} : memref<1x3x128xf32, #tpu.memory_space<vmem>>, vector<1x1x128xf32>,
      %cst_23 = arith.constant 0.000000e+00 : f32
      %54 = vector.broadcast %cst_23 : f32 to vector<4x128xf32>
      %55 = arith.cmpf one, %39, %54 : vector<4x128xf32>
      %56 = arith.extui %55 : vector<4x128xi1> to vector<4x128xi32>
      %57 = arith.sitofp %56 : vector<4x128xi32> to vector<4x128xf32>
      %cst_24 = arith.constant dense<0.000000e+00> : vector<128xf32>
      %58 = vector.multi_reduction <add>, %57, %cst_24 [0] : vector<4x128xf32> to vector<128xf32>
      %c0_25 = arith.constant 0 : index
      %c2 = arith.constant 2 : index
      %c0_26 = arith.constant 0 : index
      %59 = vector.load %arg7[%c0_25, %c2, %c0_26] : memref<1x3x128xf32, #tpu.memory_space<vmem>>, vector<1x1x128xf32>
      %60 = vector.shape_cast %59 : vector<1x1x128xf32> to vector<128xf32>
      %61 = vector.shape_cast %58 : vector<128xf32> to vector<1x1x128xf32>
      tpu.vector_store %arg7[%c0_25, %c2, %c0_26], %61 {strides = array<i32>} : memref<1x3x128xf32, #tpu.memory_space<vmem>>, vector<1x1x128xf32>,
    } else {
    }
    return
  }
  func.func @transform_0(%arg0: i32) -> (i32, i32) {
    %c0_i32 = arith.constant 0 : i32
    %0 = arith.minsi %arg0, %c0_i32 : i32
    %c0_i32_0 = arith.constant 0 : i32
    %c0_i32_1 = arith.constant 0 : i32
    return %0, %c0_i32_0 : i32, i32
  }
  func.func @transform_1(%arg0: i32) -> (i32, i32) {
    %c0_i32 = arith.constant 0 : i32
    %0 = arith.minsi %arg0, %c0_i32 : i32
    %c0_i32_0 = arith.constant 0 : i32
    %c0_i32_1 = arith.constant 0 : i32
    return %0, %c0_i32_0 : i32, i32
  }
  func.func @transform_2(%arg0: i32) -> (i32, i32) {
    %c0_i32 = arith.constant 0 : i32
    %0 = arith.minsi %arg0, %c0_i32 : i32
    %c0_i32_0 = arith.constant 0 : i32
    %c0_i32_1 = arith.constant 0 : i32
    return %0, %c0_i32_0 : i32, i32
  }
  func.func @transform_3(%arg0: i32) -> (i32, i32) {
    %c1_i32 = arith.constant 1 : i32
    %0 = arith.subi %arg0, %c1_i32 : i32
    %c0_i32 = arith.constant 0 : i32
    %1 = arith.maxsi %0, %c0_i32 : i32
    %c0_i32_0 = arith.constant 0 : i32
    %c0_i32_1 = arith.constant 0 : i32
    return %1, %c0_i32_0 : i32, i32
  }
  func.func @transform_4(%arg0: i32) -> (i32, i32) {
    %c1_i32 = arith.constant 1 : i32
    %0 = arith.subi %arg0, %c1_i32 : i32
    %c0_i32 = arith.constant 0 : i32
    %1 = arith.maxsi %0, %c0_i32 : i32
    %c0_i32_0 = arith.constant 0 : i32
    %c0_i32_1 = arith.constant 0 : i32
    return %1, %c0_i32_0 : i32, i32
  }
  func.func @transform_5(%arg0: i32) -> (i32, i32) {
    %c1_i32 = arith.constant 1 : i32
    %0 = arith.subi %arg0, %c1_i32 : i32
    %c0_i32 = arith.constant 0 : i32
    %1 = arith.maxsi %0, %c0_i32 : i32
    %c0_i32_0 = arith.constant 0 : i32
    %c0_i32_1 = arith.constant 0 : i32
    return %1, %c0_i32_0 : i32, i32
  }
  func.func @transform_6(%arg0: i32) -> (i32, i32, i32) {
    %c0_i32 = arith.constant 0 : i32
    %c0_i32_0 = arith.constant 0 : i32
    %c0_i32_1 = arith.constant 0 : i32
    return %arg0, %c0_i32, %c0_i32_0 : i32, i32, i32
  }
}

</mosaic_0001>

<bundles_post_ra>
// kernel: weighted_loss.1
= control target key start
LH: loop header
LB: loop body
LE: loop exit
PB: predicated region body
PF: predicated region fallthrough
CT: control target
= control target key end

     0   :  { %s811_s21 = smov 0   ;;  %s869_s0 = inlined_call_operand.vmem [shape: f32[16,128], index: 0, kind: input, shape index: {}]   ;;  %s870_s1 = inlined_call_operand.vmem [shape: f32[16,128], index: 1, kind: input, shape index: {}]   ;;  %s871_s2 = inlined_call_operand.vmem [shape: f32[16,128], index: 2, kind: input, shape index: {}]   ;;  %s872_s3 = inlined_call_operand.vmem [shape: f32[4,128], index: 3, kind: input, shape index: {}]   ;;  %s873_s4 = inlined_call_operand.vmem [shape: f32[4,128], index: 4, kind: input, shape index: {}]   ;;  %s874_s5 = inlined_call_operand.vmem [shape: f32[4,128], index: 5, kind: input, shape index: {}]   ;;  %s875_s6 = inlined_call_operand.vmem [shape: f32[2,3,128], index: 6, kind: output, shape index: {}]  }
   0x1 LB: > { %s817_s22 = sadd.s32 4294967295, %s772_s21   ;;  %p710_p0 = scmp.ge.s32.totalorder %s772_s21, 1  ;;  %s772_s21 = sphi %s811_s21, %s16_s21  }
   0x2   : > { %p322_p1 = scmp.lt.s32.totalorder %s772_s21, 3 }
   0x4   : > { %p323_p2 = pnand %p710_p0, %p322_p1 }
   0x5   : > { %p388_p3 = scmp.lt.s32.totalorder (!%p323_p2), %s817_s22, 0  ;;  %p448_p4 = scmp.lt.s32.totalorder (!%p323_p2), %s817_s22, 1 }
   0x6   : > { %326 = sbr.rel (%p323_p2) target bundleno = 99 (0x63), region = 44  ;;  %p739_p6 = scmp.ge.s32.totalorder (!%p323_p2), %s817_s22, 1 }
   0xb   : > { %s389_s23 = scalar_select %p388_p3, %s817_s22, 0 }
   0xc   : > { %s449_s24 = scalar_select %p448_p4, %s817_s22, 1 }
   0xd   : > { %s711_s25 = sshll.u32 %s389_s23, 1  ;;  %s740_s16 = sshll.u32 (!%p739_p6), %s817_s22, 4 }
   0xe   : > { %p391_p5 = scmp.lt.s32.totalorder %s711_s25, 1  ;;  %s738_s26 = sshll.u32 %s449_s24, 2 }
   0xf   : > { %s830_s29 = scalar_lea.vmem %s875_s6, %s738_s26  ;;  %455 = sbr.rel (%p739_p6) target bundleno = 53 (0x35), region = 48 }
  0x10   : > { %s877_s25 = smov (!%p391_p5, %s711_s25), 1 }
  0x11   : > { %s712_s30 = sshll.u32 %s877_s25, 3 }
  0x12   : > { %s394_s9 = scalar_lea.vmem %s869_s0, %s712_s30  ;;  %s404_s12 = scalar_lea.vmem %s870_s1, %s712_s30 }
  0x13   : > { %s414_s15 = scalar_lea.vmem %s871_s2, %s712_s30 }
  0x14   : > { %v463_v0 = vlaneseq  ;;  %v466_v1 = vstv %s740_s16  ;;  %v456_v3 = vld [vmem:[%s394_s9] sm:$0xff]  ;;  %v457_v8 = vld [vmem:[%s394_s9 + $0x8] sm:$0xff]  ;;  %v774_v19 = vmov 0.0  }
  0x15   : > { %v458_v4 = vld [vmem:[%s404_s12] sm:$0xff]  ;;  %v459_v9 = vld [vmem:[%s404_s12 + $0x8] sm:$0xff] }
  0x16   : > { %v464_v2 = vshrl.u32 %v463_v0, 7  ;;  %v460_v5 = vld [vmem:[%s414_s15] sm:$0xff]  ;;  %v461_v10 = vld [vmem:[%s414_s15 + $0x8] sm:$0xff] }
  0x18   : > { %v465_v6 = vadd.s32 8, %v464_v2  ;;  %v467_v7 = vadd.s32 %v466_v1, %v464_v2 }
  0x1a   : > { %v468_v11 = vadd.s32 %v466_v1, %v465_v6  ;;  %vm469_vm0 = vcmp.lt.s32.totalorder %v467_v7, 16 }
  0x1b   : > { %v475_v12 = vsel %vm469_vm0, %v456_v3, 0.0  ;;  %v477_v13 = vsel %vm469_vm0, %v458_v4, 0.0  ;;  %v479_v14 = vsel %vm469_vm0, %v460_v5, 0.0 }
  0x1c   : > { %vm470_vm1 = vcmp.lt.s32.totalorder %v468_v11, 16  ;;  %v481_v15 = vsub.f32 %v475_v12, %v477_v13  ;;  %vm487_vm2 = vcmp.gt.f32.partialorder %v479_v14, 0.0 }
  0x1d   : > { %v476_v16 = vsel %vm470_vm1, %v457_v8, 0.0  ;;  %v478_v17 = vsel %vm470_vm1, %v459_v9, 0.0  ;;  %v480_v18 = vsel %vm470_vm1, %v461_v10, 0.0  ;;  %v741_v20 = vsel %vm487_vm2, 1.0, %v774_v19 }
  0x1e   : > { %v482_v21 = vsub.f32 %v476_v16, %v478_v17  ;;  %v483_v22 = vmul.f32 %v481_v15, %v479_v14  ;;  %vm488_vm3 = vcmp.gt.f32.partialorder %v480_v18, 0.0 }
  0x1f   : > { %v742_v23 = vsel %vm488_vm3, 1.0, %v774_v19 }
  0x20   : > { %v484_v24 = vmul.f32 %v482_v21, %v480_v18  ;;  %v485_v25 = vmul.f32 %v483_v22, %v481_v15  ;;  %v503_v26 = vadd.f32 %v742_v23, %v741_v20 }
  0x22   : > { %v486_v27 = vmul.f32 %v484_v24, %v482_v21  ;;  %v489_v28 = vsel %vm487_vm2, %v485_v25, 0.0  ;;  %v504_v29 = vrot.slane %v503_v26, 4  ;;  %vm511_vm4 = vcmp.ne.f32.partialorder %v485_v25, 0.0 }
  0x23   : > { %v743_v30 = vsel %vm511_vm4, 1.0, %v774_v19 }
  0x24   : > { %v490_v31 = vsel %vm488_vm3, %v486_v27, 0.0  ;;  %v505_v32 = vadd.f32 %v504_v29, %v503_v26  ;;  %vm512_vm5 = vcmp.ne.f32.partialorder %v486_v27, 0.0 }
  0x25   : > { %v491_v33 = vadd.f32 %v490_v31, %v489_v28  ;;  %v744_v34 = vsel %vm512_vm5, 1.0, %v774_v19 }
  0x26   : > { %v506_v35 = vrot.slane %v505_v32, 2  ;;  %v517_v36 = vadd.f32 %v744_v34, %v743_v30 }
  0x27   : > { %v492_v37 = vrot.slane %v491_v33, 4 }
  0x28   : > { %v507_v38 = vadd.f32 %v506_v35, %v505_v32  ;;  %v518_v39 = vrot.slane %v517_v36, 4 }
  0x29   : > { %v493_v40 = vadd.f32 %v492_v37, %v491_v33 }
  0x2a   : > { %v508_v41 = vrot.slane %v507_v38, 1  ;;  %v519_v42 = vadd.f32 %v518_v39, %v517_v36 }
  0x2b   : > { %v494_v43 = vrot.slane %v493_v40, 2 }
  0x2c   : > { %v509_v44 = vadd.f32 %v508_v41, %v507_v38  ;;  %v520_v45 = vrot.slane %v519_v42, 2 }
  0x2d   : > { %v495_v46 = vadd.f32 %v494_v43, %v493_v40 }
  0x2e   : > { %510 = vst [vmem:[%s830_s29 + $0x1] sm:$0x1] %v509_v44  ;;  %v521_v47 = vadd.f32 %v520_v45, %v519_v42 }
  0x2f   : > { %v496_v48 = vrot.slane %v495_v46, 1 }
  0x30   : > { %v522_v49 = vrot.slane %v521_v47, 1 }
  0x31   : > { %v497_v50 = vadd.f32 %v496_v48, %v495_v46 }
  0x32   : > { %v523_v51 = vadd.f32 %v522_v49, %v521_v47 }
  0x33   : > { %498 = vst [vmem:[%s830_s29] sm:$0x1] %v497_v50 }
  0x34   : > { %524 = vst [vmem:[%s830_s29 + $0x2] sm:$0x1] %v523_v51 }
  0x35 PF: > { %528 = sbr.rel (%p448_p4) target bundleno = 99 (0x63), region = 52  ;;  %s746_s17 = sadd.s32 (!%p448_p4), 4294967295, %s817_s22 }
  0x36   : > { %s747_s18 = sshll.u32 (!%p448_p4), %s746_s17, 2 }
  0x3a   : > { %v534_v52 = vlaneseq  ;;  %v536_v54 = vstv %s747_s18  ;;  %v529_v55 = vld [vmem:[%s872_s3] sm:$0xf]  ;;  %vm557_vm7 = vcmask 1043456   ;;  %v775_v62 = vmov 0.0  }
  0x3b   : > { %v531_v57 = vld [vmem:[%s874_s5] sm:$0xf] }
  0x3c   : > { %v535_v53 = vshrl.u32 %v534_v52, 7  ;;  %v530_v61 = vld [vmem:[%s873_s4] sm:$0xf] }
  0x3e   : > { %v537_v56 = vadd.s32 %v536_v54, %v535_v53 }
  0x40   : > { %vm538_vm6 = vcmp.lt.s32.totalorder %v537_v56, 4 }
  0x41   : > { %v541_v58 = vsel %vm538_vm6, %v529_v55, 0.5  ;;  %v543_v59 = vsel %vm538_vm6, %v531_v57, 0.0  ;;  %v542_v1 = vsel %vm538_vm6, %v530_v61, 0.0 }
  0x42   : > { %762 = vlog2.f32 %v541_v58  ;;  %v549_v60 = vsub.f32 1.0, %v541_v58  ;;  %vm555_vm8 = vcmp.gt.f32.partialorder %v543_v59, 0.0  ;;  %v548_v6 = vsub.f32 1.0, %v542_v1 }
  0x43   : > { %v748_v63 = vsel %vm555_vm8, 1.0, %v775_v62  ;;  %v544_v12 = vsub.f32 0.0, %v543_v59 }
  0x44   : > { %764 = vlog2.f32 %v549_v60  ;;  %v568_v0 = vsel %vm557_vm7, %v748_v63, 0.0 }
  0x45   : > { %v569_v2 = vrot.slane %v568_v0, 4 }
  0x47   : > { %v570_v4 = vadd.f32 %v569_v2, %v568_v0 }
  0x48   : > { %v763_v3 = vpop.eup %762 }
  0x49   : > { %v546_v5 = vmul.f32 0.6931472, %v763_v3  ;;  %v571_v8 = vrot.slane %v570_v4, 2 }
  0x4a   : > { %v765_v7 = vpop.eup %764 }
  0x4b   : > { %v547_v9 = vmul.f32 %v546_v5, %v542_v1  ;;  %v551_v10 = vmul.f32 0.6931472, %v765_v7  ;;  %v572_v11 = vadd.f32 %v571_v8, %v570_v4 }
  0x4d   : > { %v552_v13 = vmul.f32 %v551_v10, %v548_v6  ;;  %v573_v14 = vrot.slane %v572_v11, 1 }
  0x4f   : > { %v553_v15 = vadd.f32 %v552_v13, %v547_v9  ;;  %v574_v16 = vadd.f32 %v573_v14, %v572_v11 }
  0x51   : > { %v554_v17 = vmul.f32 %v553_v15, %v544_v12  ;;  %575 = vst [vmem:[%s830_s29 + $0x1] sm:$0x1] %v574_v16 }
  0x53   : > { %v556_v18 = vsel %vm555_vm8, %v554_v17, 0.0  ;;  %vm576_vm9 = vcmp.ne.f32.partialorder %v554_v17, 0.0 }
  0x54   : > { %v558_v19 = vsel %vm557_vm7, %v556_v18, 0.0  ;;  %v749_v20 = vsel %vm576_vm9, 1.0, %v775_v62 }
  0x55   : > { %v559_v21 = vrot.slane %v558_v19, 4  ;;  %v579_v22 = vsel %vm557_vm7, %v749_v20, 0.0 }
  0x56   : > { %v580_v23 = vrot.slane %v579_v22, 4 }
  0x57   : > { %v560_v24 = vadd.f32 %v559_v21, %v558_v19 }
  0x58   : > { %v581_v25 = vadd.f32 %v580_v23, %v579_v22 }
  0x59   : > { %v561_v26 = vrot.slane %v560_v24, 2 }
  0x5a   : > { %v582_v27 = vrot.slane %v581_v25, 2 }
  0x5b   : > { %v562_v28 = vadd.f32 %v561_v26, %v560_v24 }
  0x5c   : > { %v583_v29 = vadd.f32 %v582_v27, %v581_v25 }
  0x5d   : > { %v563_v30 = vrot.slane %v562_v28, 1 }
  0x5e   : > { %v584_v31 = vrot.slane %v583_v29, 1 }
  0x5f   : > { %v564_v32 = vadd.f32 %v563_v30, %v562_v28 }
  0x60   : > { %v585_v33 = vadd.f32 %v584_v31, %v583_v29 }
  0x61   : > { %565 = vst [vmem:[%s830_s29] sm:$0x1] %v564_v32 }
  0x62   : > { %586 = vst [vmem:[%s830_s29 + $0x2] sm:$0x1] %v585_v33 }
  0x63 PF: > { %s16_s21 = sadd.s32 1, %s772_s21  }
  0x64   : > { %p13_p7 = scmp.ge.s32.totalorder %s16_s21, 4  }
  0x66   :  { %15 = sbr.rel (!%p13_p7) target bundleno = 1 (0x1), region = 97 }

</bundles_post_ra>
